<compile_context>
chip_gen: v7x
topology: tpu7x:2x2x1
jax: 0.10.0
libtpu: 0.0.40
codegen_flags: <defaults>
</compile_context>

<pallas_src>
import jax
import jax.numpy as jnp
from jax.experimental import pallas as pl
from jax.experimental.pallas import tpu as pltpu

PACK = 8  # batch rows packed into the lane axis per "super-row"


def _mixed_layer_kernel(x_ref, w_ref, b_ref, o_ref):
    # One fused MXU matmul (block-diagonal weight covers mu1, mu2 and the
    # identity passthrough, replicated PACK times along the diagonal for the
    # lane-packed layout), f32 accumulation, bias broadcast-add, 128-lane
    # dense store.
    o_ref[...] = (
        jnp.dot(x_ref[...], w_ref[...], preferred_element_type=jnp.float32)
        + b_ref[...]
    ).astype(o_ref.dtype)


def _round_up(n, m):
    return ((n + m - 1) // m) * m


def mixed_layer_forward(x, w1, b1, w2, b2, *, p, q, r, s, i,
                        tile_rows=32768, vmem_limit_bytes=48 * 1024 * 1024):
    """MixedLayer(prob=False) forward.

    x  : [B, p+r+i]
    w1 : [p, q]   (mu1 weight, pre-transposed to [in, out])
    b1 : [q]
    w2 : [r, s]   (mu2 weight, pre-transposed to [in, out])
    b2 : [s]
    ->   [B, q+s+i] = cat(x1 @ w1 + b1, x2 @ w2 + b2, x3)

    tile_rows: batch rows (original, un-packed) per grid step; must be a
               multiple of 64 so the packed tile is sublane-aligned.
    """
    B, in_dim = x.shape
    assert in_dim == p + r + i
    assert tile_rows % (8 * PACK) == 0, "tile_rows must be a multiple of 64"
    out_dim = q + s + i
    dtype = x.dtype
    itemsize = jnp.dtype(dtype).itemsize

    # ---- Fuse both Linears + identity into a block-diagonal weight ---------
    w_blk = jnp.zeros((in_dim, out_dim), dtype)
    w_blk = w_blk.at[0:p, 0:q].set(w1.astype(dtype))
    w_blk = w_blk.at[p:p + r, q:q + s].set(w2.astype(dtype))
    w_blk = w_blk.at[p + r:, q + s:].set(jnp.eye(i, dtype=dtype))
    b_blk = jnp.concatenate([b1.astype(jnp.float32),
                             b2.astype(jnp.float32),
                             jnp.zeros((i,), jnp.float32)])

    # ---- Pack PACK batch rows into the lane axis ----------------------------
    # Weight replicated PACK x along the diagonal -> [PACK*in, PACK*out]=[160,128]
    w_packed = jnp.kron(jnp.eye(PACK, dtype=dtype), w_blk)
    b_packed = jnp.tile(b_blk, PACK).reshape(1, PACK * out_dim)   # [1, 128]

    B8 = _round_up(B, PACK)                   # pad at most 7 rows for the reshape
    x8 = x if B8 == B else jnp.pad(x, ((0, B8 - B), (0, 0)))
    Bp = B8 // PACK
    xp = x8.reshape(Bp, PACK * in_dim)        # free row-major reinterpretation

    # ---- Batch tile in packed rows ------------------------------------------
    tile_bp = tile_rows // PACK
    if Bp > tile_bp:
        tb = tile_bp                          # multiple of 8 by the assert above
    elif Bp >= 128:
        # Whole batch fits one tile but is big: split into >=2 grid steps so
        # ("parallel",) can shard across the two v7x TensorCores.
        tb = _round_up(pl.cdiv(Bp, 2), 8)
    else:
        tb = Bp                               # single full-extent block
    grid = (pl.cdiv(Bp, tb),)                 # partial edge block: Pallas clips writes

    cost = pl.CostEstimate(
        flops=2 * Bp * (PACK * in_dim) * (PACK * out_dim),
        transcendentals=0,
        bytes_accessed=Bp * PACK * (in_dim + out_dim) * itemsize
        + w_packed.size * itemsize + b_packed.size * 4,
    )

    out_p = pl.pallas_call(
        _mixed_layer_kernel,
        out_shape=jax.ShapeDtypeStruct((Bp, PACK * out_dim), dtype),
        grid_spec=pltpu.PrefetchScalarGridSpec(
            num_scalar_prefetch=0,
            grid=grid,
            in_specs=[
                # Batch-tiled packed input; last dim (160) is the full extent.
                pl.BlockSpec((tb, PACK * in_dim), lambda b: (b, 0)),
                # Weight / bias: same block every step -> VMEM resident.
                pl.BlockSpec((PACK * in_dim, PACK * out_dim), lambda b: (0, 0)),
                pl.BlockSpec((1, PACK * out_dim), lambda b: (0, 0)),
            ],
            # Output block is exactly 128 lanes -> unmasked, lane-dense stores.
            out_specs=pl.BlockSpec((tb, PACK * out_dim), lambda b: (b, 0)),
        ),
        compiler_params=pltpu.CompilerParams(
            # Batch axis is embarrassingly parallel -> megacore on v7x,
            # harmless on v5e/v6e.
            dimension_semantics=("parallel",),
            vmem_limit_bytes=vmem_limit_bytes,
        ),
        cost_estimate=cost,
    )(xp, w_packed, b_packed)

    out = out_p.reshape(B8, out_dim)          # free reinterpretation back
    return out if B8 == B else out[:B]


def _init_linear_params(key, in_dim, out_dim):
    """Matches init_params(): trunc_normal(std=0.01, a=-0.02, b=0.02) for
    weights (dim>1), uniform(0.1, 0.2) for biases (dim==1)."""
    kw, kb = jax.random.split(key)
    # PyTorch weight shape is [out, in]; transposed to [in, out] for the kernel.
    w = 0.01 * jax.random.truncated_normal(kw, -2.0, 2.0, (out_dim, in_dim), jnp.float32)
    b = jax.random.uniform(kb, (out_dim,), jnp.float32, minval=0.1, maxval=0.2)
    return w, b


if __name__ == "__main__":
    # Module dims: MixedLayer(p, q, r, s, i)
    p, q, r, s, i = 8, 6, 8, 6, 4

    root = jax.random.PRNGKey(0)
    kx, k1, k2 = jax.random.split(root, 3)

    w1_pt, b1 = _init_linear_params(k1, p, q)   # mu1: nn.Linear(p, q)
    w2_pt, b2 = _init_linear_params(k2, r, s)   # mu2: nn.Linear(r, s)

    def reference(x):
        return jnp.concatenate(
            [x[:, :p] @ w1_pt.T + b1,
             x[:, p:p + r] @ w2_pt.T + b2,
             x[:, p + r:p + r + i]], axis=1)

    # Configurations exercised:
    #   B=4     : needs the <=7-row pack pad, single full-extent block.
    #   B=200   : B % 8 == 0, 25 packed rows, single full-extent block, no pad.
    #   B=1040  : 130 packed rows -> 2-step grid via the megacore split branch.
    #   B=1040 / tile_rows=512 : 3-step grid with a partial edge block
    #                            (write-clipping path).
    for B, tile_rows in [(4, 32768), (200, 32768), (1040, 32768), (1040, 512)]:
        x = jax.random.normal(jax.random.fold_in(kx, B), (B, p + r + i), jnp.float32)
        out = mixed_layer_forward(
            x, w1_pt.T, b1, w2_pt.T, b2, p=p, q=q, r=r, s=s, i=i,
            tile_rows=tile_rows)
        out = jax.block_until_ready(out)
        assert out.shape == (B, q + s + i)
        assert jnp.allclose(out, reference(x), atol=1e-5, rtol=1e-5)

    print("KERNEL_OK")
</pallas_src>

<mosaic_0001>
module attributes {stable_mosaic.version = 11 : i64} {
  func.func @_mixed_layer_kernel(%arg0: i32, %arg1: memref<1x160xf32, #tpu.memory_space<vmem>>, %arg2: memref<160x128xf32, #tpu.memory_space<vmem>>, %arg3: memref<1x128xf32, #tpu.memory_space<vmem>>, %arg4: memref<1x128xf32, #tpu.memory_space<vmem>>) attributes {dimension_semantics = [#tpu.dimension_semantics<parallel>], iteration_bounds = array<i64: 1>, scalar_prefetch = 0 : i64, scratch_operands = 0 : i64, tpu.core_type = #tpu.core_type<tc>, window_params = [{transform_indices = @transform_0, window_bounds = array<i64: 1, 160>}, {pipeline_mode = #tpu.pipeline_mode<synchronous>, transform_indices = @transform_1, window_bounds = array<i64: 160, 128>}, {pipeline_mode = #tpu.pipeline_mode<synchronous>, transform_indices = @transform_2, window_bounds = array<i64: 1, 128>}, {transform_indices = @transform_3, window_bounds = array<i64: 1, 128>}]} {
    %c0 = arith.constant 0 : index
    %c0_0 = arith.constant 0 : index
    %0 = vector.load %arg1[%c0, %c0_0] : memref<1x160xf32, #tpu.memory_space<vmem>>, vector<1x160xf32>
    %c0_1 = arith.constant 0 : index
    %c0_2 = arith.constant 0 : index
    %1 = vector.load %arg2[%c0_1, %c0_2] : memref<160x128xf32, #tpu.memory_space<vmem>>, vector<160x128xf32>
    %cst = arith.constant dense<0.000000e+00> : vector<1x128xf32>
    %2 = tpu.matmul %0, %1, %cst {dimension_numbers = #tpu.dot_dimension_numbers<[1], [0], [0], [1], [0, 0, 1, 1], [], []>} : vector<1x160xf32>, vector<160x128xf32>, vector<1x128xf32> -> vector<1x128xf32>
    %c0_3 = arith.constant 0 : index
    %c0_4 = arith.constant 0 : index
    %3 = vector.load %arg3[%c0_3, %c0_4] : memref<1x128xf32, #tpu.memory_space<vmem>>, vector<1x128xf32>
    %4 = arith.addf %2, %3 : vector<1x128xf32>
    %c0_5 = arith.constant 0 : index
    %c0_6 = arith.constant 0 : index
    %5 = vector.load %arg4[%c0_5, %c0_6] : memref<1x128xf32, #tpu.memory_space<vmem>>, vector<1x128xf32>
    tpu.vector_store %arg4[%c0_5, %c0_6], %4 {strides = array<i32>} : memref<1x128xf32, #tpu.memory_space<vmem>>, vector<1x128xf32>,
    return
  }
  func.func @transform_0(%arg0: i32) -> (i32, i32) {
    %c0_i32 = arith.constant 0 : i32
    %c0_i32_0 = arith.constant 0 : i32
    return %arg0, %c0_i32 : i32, i32
  }
  func.func @transform_1(%arg0: i32) -> (i32, i32) {
    %c0_i32 = arith.constant 0 : i32
    %c0_i32_0 = arith.constant 0 : i32
    %c0_i32_1 = arith.constant 0 : i32
    return %c0_i32, %c0_i32_0 : i32, i32
  }
  func.func @transform_2(%arg0: i32) -> (i32, i32) {
    %c0_i32 = arith.constant 0 : i32
    %c0_i32_0 = arith.constant 0 : i32
    %c0_i32_1 = arith.constant 0 : i32
    return %c0_i32, %c0_i32_0 : i32, i32
  }
  func.func @transform_3(%arg0: i32) -> (i32, i32) {
    %c0_i32 = arith.constant 0 : i32
    %c0_i32_0 = arith.constant 0 : i32
    return %arg0, %c0_i32 : i32, i32
  }
}

</mosaic_0001>

<bundles_post_ra>
// kernel: tpu_custom_call.1
= control target key start
LH: loop header
LB: loop body
LE: loop exit
PB: predicated region body
PF: predicated region fallthrough
CT: control target
= control target key end

     0   :  { %8 = vsyncpa [#allocation3], 0  ;;  %s344_s0 = inlined_call_operand.hbm [shape: f32[1,160], index: 0, kind: input, shape index: {}]   ;;  %s345_s1 = inlined_call_operand.hbm [shape: f32[160,128], index: 1, kind: input, shape index: {}]   ;;  %s346_s2 = inlined_call_operand.vmem [shape: f32[1,128], index: 2, kind: input, shape index: {}]   ;;  %s347_s3 = inlined_call_operand.hbm [shape: f32[1,128], index: 3, kind: output, shape index: {}]  }
   0x1   :  { %9 = vsyncpa [#allocation6], 0 }
   0x2   :  { %10 = vsyncpa [#allocation4], 0  ;;  %s272_s12 = smov [#allocation2]   ;;  %s273_s14 = smov [#allocation5]  }
   0x3   :  { %s17_s13 = sshll.u32 %s272_s12, 4  ;;  %s26_s15 = sshll.u32 %s273_s14, 4  ;;  %s18_s13 = int_to_ptr.vmem [resolvable:$true] %s17_s13  ;;  %s298_s15 = int_to_ptr.vmem [resolvable:$true] %s26_s15 }
   0x4   :  { %s200_s18 = scalar_lea.hbm %s344_s0, 32 }
   0x5   :  { %p201_p0 = scmp.ne.s32.totalorder %s344_s0, %s200_s18  ;;  %p204_p1 = scmp.lt.u32.totalorder %s200_s18, %s344_s0 }
   0x7   :  { %p206_p2 = pnand %p204_p1, %p201_p0 }
   0x9   :  { %209 = shalt.err (!%p206_p2)
}
   0xa   :  { %s210_s23 = scalar_lea.vmem %s18_s13, 32  ;;  %p215_p4 = scmp.lt.s32.totalorder %s18_s13, %s18_s13 }
   0xb   :  { %p211_p3 = scmp.ne.s32.totalorder %s18_s13, %s210_s23  ;;  %p216_p5 = scmp.lt.s32.totalorder %s210_s23, %s210_s23 }
   0xd   :  { %p217_p6 = por %p216_p5, %p215_p4 }
   0xf   :  { %p218_p7 = pnand %p217_p6, %p211_p3 }
  0x11   :  { %221 = shalt.err (!%p218_p7)
}
  0x12   :  { %20 = dma.hbm_to_vmem [thread:$0]  %s344_s0, 32, %s18_s13, [#allocation3]  }
  0x13   :  { %s222_s28 = scalar_lea.hbm %s345_s1, 2560 }
  0x14   :  { %p223_p8 = scmp.ne.s32.totalorder %s345_s1, %s222_s28  ;;  %p226_p9 = scmp.lt.u32.totalorder %s222_s28, %s345_s1 }
  0x16   :  { %p228_p10 = pnand %p226_p9, %p223_p8 }
  0x18   :  { %231 = shalt.err (!%p228_p10)
}
  0x19   :  { %s232_s6 = scalar_lea.vmem %s298_s15, 2560  ;;  %p237_p12 = scmp.lt.s32.totalorder %s298_s15, %s298_s15 }
  0x1a   :  { %p233_p11 = scmp.ne.s32.totalorder %s298_s15, %s232_s6  ;;  %p238_p13 = scmp.lt.s32.totalorder %s232_s6, %s232_s6 }
  0x1c   :  { %p239_p0 = por %p238_p13, %p237_p12 }
  0x1e   :  { %p240_p1 = pnand %p239_p0, %p233_p11 }
  0x20   :  { %243 = shalt.err (!%p240_p1)
}
  0x21   :  { %s274_s0 = smov 128   ;;  %s275_s7 = smov 8  }
  0x22   :  { %32 = dma.hbm_to_vmem [thread:$0]  %s345_s1, 2560, %s298_s15, [#allocation6], %s274_s0, %s274_s0, %s275_s7  }
  0x23   :  { %266 = dma.done.wait [#allocation3], 32  }
  0x24   :  { %267 = vsyncadd [#allocation3], 4294967264 }
  0x25   :  { %268 = dma.done.wait [#allocation6], 2560  }
  0x26   :  { %269 = vsyncadd [#allocation6], 4294964736  ;;  %v276_v0 = vmov 0.0|0.0   ;;  %v64_v1 = vlaneseq  ;;  %v42_v3 = vld [vmem:[#allocation5] sm:$0xff]  ;;  %v43_v4 = vld [vmem:[#allocation5 + $0x8] sm:$0xff]  ;;  %vm73_vm0 = vcmask 261120  }
  0x27   :  { %164 = vmatprep.subr.bf16.mxu0 %v276_v0  ;;  %v44_v5 = vld [vmem:[#allocation5 + $0x10] sm:$0xff]  ;;  %v165_v6 = vpack.c.bf16 %v43_v4, %v42_v3  ;;  %v45_v7 = vld [vmem:[#allocation5 + $0x18] sm:$0xff]  ;;  %v46_v10 = vld [vmem:[#allocation5 + $0x20] sm:$0xff]  ;;  %s277_s11 = smov [#allocation7]  }
  0x28   :  { %v65_v2 = vshrl.u32 %v64_v1, 7  ;;  %v168_v8 = vpack.c.bf16 %v45_v7, %v44_v5  ;;  %v47_v11 = vld [vmem:[#allocation5 + $0x28] sm:$0xff]  ;;  %v41_v12 = vld [vmem:[#allocation2] sm:$0x3]  ;;  %v48_v15 = vld [vmem:[#allocation5 + $0x30] sm:$0xff]  ;;  %s153_s12 = sshll.u32 %s277_s11, 4  ;;  %s154_s12 = int_to_ptr.vmem [resolvable:$true] %s153_s12 }
  0x29   :  { %166 = vmatpush1.bf16.msra.mxu0 %v165_v6  ;;  %v171_v13 = vpack.c.bf16 %v47_v11, %v46_v10  ;;  %v49_v16 = vld [vmem:[#allocation5 + $0x38] sm:$0xff]  ;;  %v50_v18 = vld [vmem:[#allocation5 + $0x40] sm:$0xff]  ;;  %v51_v19 = vld [vmem:[#allocation5 + $0x48] sm:$0xff]  ;;  %s244_s13 = scalar_lea.vmem %s154_s12, 16  ;;  %s248_s14 = scalar_lea.vmem %s154_s12, 32 }
  0x2a   :  { %v70_v9 = vsub.s32 1, %v65_v2  ;;  %167 = vmatprep.subr.bf16.mxu0 %v276_v0  ;;  %v174_v17 = vpack.c.bf16 %v49_v16, %v48_v15  ;;  %v177_v20 = vpack.c.bf16 %v51_v19, %v50_v18  ;;  %v52_v21 = vld [vmem:[#allocation5 + $0x50] sm:$0xff]  ;;  %v53_v22 = vld [vmem:[#allocation5 + $0x58] sm:$0xff]  ;;  %v54_v24 = vld [vmem:[#allocation5 + $0x60] sm:$0xff]  ;;  %v66_v35 = vsub.s32 0, %v65_v2  ;;  %p245_p2 = scmp.ne.s32.totalorder %s154_s12, %s244_s13  ;;  %p249_p3 = scmp.lt.s32.totalorder %s154_s12, %s154_s12 }
  0x2b   :  { %v180_v23 = vpack.c.bf16 %v53_v22, %v52_v21  ;;  %v55_v25 = vld [vmem:[#allocation5 + $0x68] sm:$0xff]  ;;  %v56_v27 = vld [vmem:[#allocation5 + $0x70] sm:$0xff]  ;;  %v57_v28 = vld [vmem:[#allocation5 + $0x78] sm:$0xff]  ;;  %p250_p4 = scmp.lt.s32.totalorder %s248_s14, %s244_s13 }
  0x2c   :  { %v71_v14 = vrot.slane %v41_v12, %v70_v9  ;;  %v183_v26 = vpack.c.bf16 %v55_v25, %v54_v24  ;;  %v186_v29 = vpack.c.bf16 %v57_v28, %v56_v27  ;;  %v58_v30 = vld [vmem:[#allocation5 + $0x80] sm:$0xff]  ;;  %v59_v31 = vld [vmem:[#allocation5 + $0x88] sm:$0xff]  ;;  %v60_v33 = vld [vmem:[#allocation5 + $0x90] sm:$0xff]  ;;  %v67_v37 = vrot.slane %v41_v12, %v66_v35 }
  0x2d   :  { %169 = vmatpush1.bf16.msra.mxu0 %v168_v8  ;;  %v189_v32 = vpack.c.bf16 %v59_v31, %v58_v30  ;;  %v61_v34 = vld [vmem:[#allocation5 + $0x98] sm:$0xff]  ;;  %p251_p5 = por %p250_p4, %p249_p3 }
  0x2e   :  { %170 = vmatprep.subr.bf16.mxu0 %v276_v0  ;;  %163 = vmatprep.mubr.msk.f32.mxu0 %vm73_vm0, %v71_v14  ;;  %v192_v36 = vpack.c.bf16 %v61_v34, %v60_v33  ;;  %v62_v38 = vld [vmem:[%s346_s2] sm:$0x1] }
  0x2f   :  { %p252_p6 = pnand %p251_p5, %p245_p2 }
  0x31   :  { %172 = vmatpush1.bf16.msra.mxu0 %v171_v13 }
  0x32   :  { %173 = vmatprep.subr.bf16.mxu0 %v276_v0 }
  0x35   :  { %175 = vmatpush1.bf16.msra.mxu0 %v174_v17 }
  0x36   :  { %176 = vmatprep.subr.bf16.mxu0 %v276_v0 }
  0x39   :  { %178 = vmatpush1.bf16.msra.mxu0 %v177_v20 }
  0x3a   :  { %179 = vmatprep.subr.bf16.mxu0 %v276_v0 }
  0x3d   :  { %181 = vmatpush1.bf16.msra.mxu0 %v180_v23 }
  0x3e   :  { %182 = vmatprep.subr.bf16.mxu0 %v276_v0 }
  0x41   :  { %184 = vmatpush1.bf16.msra.mxu0 %v183_v26 }
  0x42   :  { %185 = vmatprep.subr.bf16.mxu0 %v276_v0 }
  0x45   :  { %187 = vmatpush1.bf16.msra.mxu0 %v186_v29 }
  0x46   :  { %188 = vmatprep.subr.bf16.mxu0 %v276_v0 }
  0x49   :  { %190 = vmatpush1.bf16.msra.mxu0 %v189_v32 }
  0x4a   :  { %191 = vmatprep.subr.bf16.mxu0 %v276_v0 }
  0x4d   :  { %193 = vmatpush1.bf16.msra.mxu0 %v192_v36 }
  0x50   :  { %141 = vmatmul.mubr.f32.vlgmr.msra.gmra.mrb[0].mxu0 %v67_v37 }
 0x123   :  { %v142_v39 = vpop.f32.mrb[0].mxu0 }
 0x124   :  { %v143_v40 = vadd.f32 %v142_v39, %v62_v38  ;;  %v144_v41 = vpop.f32.mrb[1].mxu0 }
 0x126   :  { %146 = vst [vmem:[#allocation7] sm:$0x1] %v143_v40 }
 0x127   :  { %255 = shalt.err (!%p252_p6)
}
 0x128   :  { %s256_s17 = scalar_lea.hbm %s347_s3, 16 }
 0x129   :  { %p257_p7 = scmp.ne.s32.totalorder %s347_s3, %s256_s17  ;;  %p260_p8 = scmp.lt.u32.totalorder %s256_s17, %s347_s3 }
 0x12b   :  { %p262_p9 = pnand %p260_p8, %p257_p7 }
 0x12d   :  { %265 = shalt.err (!%p262_p9)
}
 0x12e   :  { %156 = dma.vmem_to_hbm [thread:$0]  %s154_s12, 16, %s347_s3, [#allocation4]  }
 0x12f   :  { %270 = dma.done.wait [#allocation4], 16  }
 0x130   :  { %271 = vsyncadd [#allocation4], 4294967280 }
 0x131   :  { %160 = vsyncpa [#allocation3], 1 }
 0x132   :  { %161 = vsyncpa [#allocation6], 1 }
 0x133   :  { %162 = vsyncpa [#allocation4], 1 }

</bundles_post_ra>
